<compile_context>
chip_gen: v5e
topology: v5e:2x2
jax: 0.10.0
libtpu: 0.0.40
codegen_flags: <defaults>
</compile_context>

<pallas_src>
import functools
import math

import jax
import jax.numpy as jnp
from jax.experimental import pallas as pl
from jax.experimental.pallas import tpu as pltpu

_VMEM_LIMIT = 64 * 1024 * 1024


# ----------------------------- tile helpers ---------------------------------

def _row_tile(m, target=256):
    """Largest f32 row tile <= target that divides m and is a multiple of 8 (or full m).
    If that would give a single block, halve it (when legal) so a 'parallel' row grid
    has >= 2 blocks for v7x's two TensorCores.
    TODO(synk): sublane multiple becomes 16 if activations move to bf16."""
    best = m
    if m > 8:
        cand = (min(m, target) // 8) * 8
        while cand >= 8:
            if m % cand == 0:
                best = cand
                break
            cand -= 8
    if best == m and m >= 16 and (m // 2) % 8 == 0:
        best = m // 2
    return best


def _col_tile(n, target=512):
    """Largest col tile <= target that divides n and is a multiple of 128 (or full n)."""
    if n <= target:
        return n
    t = (target // 128) * 128
    while t >= 128:
        if n % t == 0:
            return t
        t -= 128
    return n


# ----------------------------- Pallas kernels -------------------------------

def _layer_kernel(x_ref, ln1g_ref, ln1b_ref, wqkv_ref, bqkv_ref, wo_ref, bo_ref,
                  cos_ref, sins_ref, ln2g_ref, ln2b_ref, w1_ref, b1_ref,
                  w2_ref, b2_ref, o_ref, attn_scr, *, n_heads):
    """One full transformer layer for one batch tile, entirely VMEM-resident."""
    x = x_ref[...]                                  # (T, C)
    T, C = x.shape
    hd = C // n_heads

    # ---- LayerNorm 1 ----
    mean = jnp.mean(x, axis=-1, keepdims=True)
    var = jnp.mean(jnp.square(x - mean), axis=-1, keepdims=True)
    h = (x - mean) * jax.lax.rsqrt(var + 1e-5) * ln1g_ref[...] + ln1b_ref[...]

    # ---- fused QKV projection: one (T,C)x(C,3C) MXU pass ----
    qkv = jnp.dot(h, wqkv_ref[...], preferred_element_type=jnp.float32) + bqkv_ref[...]
    q = qkv[:, 0 * C:1 * C]
    k = qkv[:, 1 * C:2 * C]
    v = qkv[:, 2 * C:3 * C]

    # ---- RoPE (sign-folded sin table: rotate-half = single concat, no negate) ----
    cos = cos_ref[...]
    sin_s = sins_ref[...]

    def rope(t):
        rot = jnp.concatenate([t[:, C // 2:], t[:, :C // 2]], axis=-1)
        return t * cos + rot * sin_s

    q = rope(q) * (1.0 / math.sqrt(hd))             # fold attention scale into q once
    k = rope(k)

    # causal mask (diagonal unmasked -> finite row max)
    row = jax.lax.broadcasted_iota(jnp.int32, (T, T), 0)
    col = jax.lax.broadcasted_iota(jnp.int32, (T, T), 1)
    causal = col <= row

    # ---- per-head attention; each head writes its lane slice of the VMEM scratch ----
    # TODO(synk): flash-style KV-block online softmax needed for large T (v7x VMEM).
    for hh in range(n_heads):
        sl = slice(hh * hd, (hh + 1) * hd)
        s = jnp.dot(q[:, sl], k[:, sl].T, preferred_element_type=jnp.float32)  # (T, T)
        s = jnp.where(causal, s, -1e30)
        s = s - jnp.max(s, axis=-1, keepdims=True)
        p = jnp.exp(s)
        inv = pl.reciprocal(jnp.sum(p, axis=-1, keepdims=True), approx=True)
        attn_scr[:, sl] = jnp.dot(p, v[:, sl], preferred_element_type=jnp.float32) * inv

    attn_out = (jnp.dot(attn_scr[...], wo_ref[...], preferred_element_type=jnp.float32)
                + bo_ref[...])
    x2 = h + attn_out            # residual from layer_norm_1(x), as in the reference model

    # ---- LayerNorm 2 + MLP (the (T, 4C) intermediate never touches HBM) ----
    mean2 = jnp.mean(x2, axis=-1, keepdims=True)
    var2 = jnp.mean(jnp.square(x2 - mean2), axis=-1, keepdims=True)
    h2 = (x2 - mean2) * jax.lax.rsqrt(var2 + 1e-5) * ln2g_ref[...] + ln2b_ref[...]

    m = jnp.dot(h2, w1_ref[...], preferred_element_type=jnp.float32) + b1_ref[...]
    m = 0.5 * m * (1.0 + jax.lax.erf(m * (1.0 / math.sqrt(2.0))))   # exact GELU (torch default)
    m = jnp.dot(m, w2_ref[...], preferred_element_type=jnp.float32) + b2_ref[...]
    o_ref[...] = h2 + m          # residual from layer_norm_2(x), as in the reference model


def layer_block_pallas(x, blk, cos_t, sin_s, *, B, T, n_heads):
    M, C = x.shape
    C3 = 3 * C
    Ch = blk["fc1"][0].shape[1]            # 4C
    kernel = functools.partial(_layer_kernel, n_heads=n_heads)
    row_spec = pl.BlockSpec((T, C), lambda b: (b, 0))
    vecC = pl.BlockSpec((1, C), lambda b: (0, 0))
    tc_spec = pl.BlockSpec((T, C), lambda b: (0, 0))
    return pl.pallas_call(
        kernel,
        out_shape=jax.ShapeDtypeStruct((M, C), jnp.float32),
        grid=(B,),
        in_specs=[row_spec, vecC, vecC,
                  pl.BlockSpec((C, C3), lambda b: (0, 0)),
                  pl.BlockSpec((1, C3), lambda b: (0, 0)),
                  pl.BlockSpec((C, C), lambda b: (0, 0)), vecC,
                  tc_spec, tc_spec,
                  vecC, vecC,
                  pl.BlockSpec((C, Ch), lambda b: (0, 0)),
                  pl.BlockSpec((1, Ch), lambda b: (0, 0)),
                  pl.BlockSpec((Ch, C), lambda b: (0, 0)),
                  vecC],
        out_specs=row_spec,
        scratch_shapes=[pltpu.VMEM((T, C), jnp.float32)],
        compiler_params=pltpu.CompilerParams(
            dimension_semantics=("parallel",),
            vmem_limit_bytes=_VMEM_LIMIT),
    )(x,
      blk["ln1_g"].reshape(1, C), blk["ln1_b"].reshape(1, C),
      blk["qkv"][0], blk["qkv"][1].reshape(1, C3),
      blk["o"][0], blk["o"][1].reshape(1, C),
      cos_t, sin_s,
      blk["ln2_g"].reshape(1, C), blk["ln2_b"].reshape(1, C),
      blk["fc1"][0], blk["fc1"][1].reshape(1, Ch),
      blk["fc2"][0], blk["fc2"][1].reshape(1, C))


def _linear_kernel(x_ref, w_ref, b_ref, o_ref):
    o_ref[...] = (jnp.dot(x_ref[...], w_ref[...], preferred_element_type=jnp.float32)
                  + b_ref[...])


def linear_pallas(x, w_t, b):
    # x: [M, K], w_t: [K, N] (pre-transposed), b: [N]; N is a multiple of 128 (lane-dense).
    M, K = x.shape
    N = w_t.shape[1]
    tm = _row_tile(M)
    tn = _col_tile(N)
    return pl.pallas_call(
        _linear_kernel,
        out_shape=jax.ShapeDtypeStruct((M, N), jnp.float32),
        grid=(M // tm, N // tn),
        in_specs=[pl.BlockSpec((tm, K), lambda i, j: (i, 0)),
                  pl.BlockSpec((K, tn), lambda i, j: (0, j)),
                  pl.BlockSpec((1, tn), lambda i, j: (0, j))],
        out_specs=pl.BlockSpec((tm, tn), lambda i, j: (i, j)),
        compiler_params=pltpu.CompilerParams(
            dimension_semantics=("parallel", "parallel"),
            vmem_limit_bytes=_VMEM_LIMIT),
    )(x, w_t, b.reshape(1, N))


# --------------------------- parameters / glue ------------------------------

def build_rope_cache(context_length, d, base=10000.0):
    theta = 1.0 / (base ** (jnp.arange(0, d, 2, dtype=jnp.float32) / d))
    seq = jnp.arange(context_length, dtype=jnp.float32)[:, None]
    m_theta = seq * theta[None, :]
    m_theta = jnp.tile(m_theta, (1, 2))                     # torch .repeat(1, 2)
    return jnp.cos(m_theta), jnp.sin(m_theta)


def init_params(key, config):
    V, C, L = config["vocab_size"], config["n_embed"], config["n_layers"]
    Vp = ((V + 127) // 128) * 128     # pad lm_head output lanes to a multiple of 128

    def lin(k, din, dout):
        # weights stored pre-transposed as [in, out] so no per-forward .T copies
        kw, kb = jax.random.split(k)
        w_t = jax.random.normal(kw, (din, dout), jnp.float32) * 0.02
        b = jax.random.normal(kb, (dout,), jnp.float32) * 0.02
        return w_t, b

    keys = jax.random.split(key, 2 + L)
    params = {"embed": jax.random.normal(keys[0], (V, C), jnp.float32) * 0.02}
    blocks = []
    for l in range(L):
        ks = jax.random.split(keys[2 + l], 4)
        blocks.append({
            "ln1_g": jnp.ones((C,), jnp.float32), "ln1_b": jnp.zeros((C,), jnp.float32),
            "ln2_g": jnp.ones((C,), jnp.float32), "ln2_b": jnp.zeros((C,), jnp.float32),
            "qkv": lin(ks[0], C, 3 * C),          # packed q|k|v -> one MXU pass
            "o": lin(ks[1], C, C),
            "fc1": lin(ks[2], C, 4 * C), "fc2": lin(ks[3], 4 * C, C),
        })
    params["blocks"] = blocks
    # lm_head generated at padded width; the extra (never-used) columns are sliced off.
    params["lm_head"] = lin(keys[1], C, Vp)
    return params


def gpt_forward_pallas(ids, params, config, cos, sin):
    B, T = ids.shape
    C, H, V = config["n_embed"], config["n_heads"], config["vocab_size"]

    # TODO(synk): embedding gather kept as JAX glue (no clean dense-Pallas equivalent).
    x = params["embed"][ids].reshape(B * T, C)              # [B*T, C]
    cos_t = cos[:T]                                         # [T, C]
    # sign-folded sin: rotate-half's negation is baked into the table once per forward
    sin_t = sin[:T]
    sin_s = jnp.concatenate([-sin_t[:, :C // 2], sin_t[:, C // 2:]], axis=-1)

    for blk in params["blocks"]:
        x = layer_block_pallas(x, blk, cos_t, sin_s, B=B, T=T, n_heads=H)

    logits = linear_pallas(x, params["lm_head"][0], params["lm_head"][1])
    return logits[:, :V].reshape(B, T, V)


# --------------------------- pure-JAX reference -----------------------------

def gpt_forward_ref(ids, params, config, cos, sin):
    B, T = ids.shape
    C, H, V = config["n_embed"], config["n_heads"], config["vocab_size"]
    hd = C // H
    x = params["embed"][ids]

    def ln(t, g, b):
        m = t.mean(-1, keepdims=True)
        v_ = jnp.mean((t - m) ** 2, -1, keepdims=True)
        return (t - m) / jnp.sqrt(v_ + 1e-5) * g + b

    def rope(t):
        nh = jnp.concatenate([-t[..., C // 2:], t[..., :C // 2]], -1)
        return t * cos[:T] + nh * sin[:T]

    for blk in params["blocks"]:
        h = ln(x, blk["ln1_g"], blk["ln1_b"])
        wqkv, bqkv = blk["qkv"]
        q = h @ wqkv[:, :C] + bqkv[:C]
        k = h @ wqkv[:, C:2 * C] + bqkv[C:2 * C]
        v = h @ wqkv[:, 2 * C:] + bqkv[2 * C:]
        q, k = rope(q), rope(k)
        q = q.reshape(B, T, H, hd).transpose(0, 2, 1, 3)
        k = k.reshape(B, T, H, hd).transpose(0, 2, 1, 3)
        v = v.reshape(B, T, H, hd).transpose(0, 2, 1, 3)
        s = (q @ jnp.swapaxes(k, -1, -2)) / math.sqrt(hd)
        mask = jnp.tril(jnp.ones((T, T), jnp.float32))
        s = jnp.where(mask == 0, -jnp.inf, s)
        p = jax.nn.softmax(s, axis=-1)
        a = (p @ v).transpose(0, 2, 1, 3).reshape(B, T, C)
        a = a @ blk["o"][0] + blk["o"][1]
        x = h + a
        h2 = ln(x, blk["ln2_g"], blk["ln2_b"])
        m = h2 @ blk["fc1"][0] + blk["fc1"][1]
        m = 0.5 * m * (1.0 + jax.lax.erf(m / math.sqrt(2.0)))
        m = m @ blk["fc2"][0] + blk["fc2"][1]
        x = h2 + m
    logits = x @ params["lm_head"][0] + params["lm_head"][1]
    return logits[..., :V]


# --------------------------------- main --------------------------------------

if __name__ == "__main__":
    config = dict(vocab_size=64, n_embed=32, n_heads=4, n_layers=2, context_length=8)
    key = jax.random.PRNGKey(0)
    kp, kx = jax.random.split(key)

    params = init_params(kp, config)
    B, T = 2, config["context_length"]
    ids = jax.random.randint(kx, (B, T), 0, config["vocab_size"], dtype=jnp.int32)
    cos, sin = build_rope_cache(config["context_length"], config["n_embed"])

    logits = gpt_forward_pallas(ids, params, config, cos, sin)
    logits = jax.block_until_ready(logits)

    ref = gpt_forward_ref(ids, params, config, cos, sin)
    assert logits.shape == (B, T, config["vocab_size"])
    # tolerance slightly looser than 1e-4 only because of the approx softmax reciprocal
    assert jnp.allclose(logits, ref, atol=1e-3, rtol=1e-3), "mismatch vs pure-JAX reference"
    print("KERNEL_OK")
</pallas_src>

<mosaic_0001>
module attributes {stable_mosaic.version = 11 : i64} {
  func.func @_layer_kernel(%arg0: i32, %arg1: memref<8x32xf32, #tpu.memory_space<vmem>>, %arg2: memref<1x32xf32, #tpu.memory_space<vmem>>, %arg3: memref<1x32xf32, #tpu.memory_space<vmem>>, %arg4: memref<32x96xf32, #tpu.memory_space<vmem>>, %arg5: memref<1x96xf32, #tpu.memory_space<vmem>>, %arg6: memref<32x32xf32, #tpu.memory_space<vmem>>, %arg7: memref<1x32xf32, #tpu.memory_space<vmem>>, %arg8: memref<8x32xf32, #tpu.memory_space<vmem>>, %arg9: memref<8x32xf32, #tpu.memory_space<vmem>>, %arg10: memref<1x32xf32, #tpu.memory_space<vmem>>, %arg11: memref<1x32xf32, #tpu.memory_space<vmem>>, %arg12: memref<32x128xf32, #tpu.memory_space<vmem>>, %arg13: memref<1x128xf32, #tpu.memory_space<vmem>>, %arg14: memref<128x32xf32, #tpu.memory_space<vmem>>, %arg15: memref<1x32xf32, #tpu.memory_space<vmem>>, %arg16: memref<8x32xf32, #tpu.memory_space<vmem>>, %arg17: memref<8x32xf32, #tpu.memory_space<vmem>>) attributes {dimension_semantics = [#tpu.dimension_semantics<parallel>], iteration_bounds = array<i64: 2>, scalar_prefetch = 0 : i64, scratch_operands = 1 : i64, tpu.core_type = #tpu.core_type<tc>, window_params = [{transform_indices = @transform_0, window_bounds = array<i64: 8, 32>}, {pipeline_mode = #tpu.pipeline_mode<synchronous>, transform_indices = @transform_1, window_bounds = array<i64: 1, 32>}, {pipeline_mode = #tpu.pipeline_mode<synchronous>, transform_indices = @transform_2, window_bounds = array<i64: 1, 32>}, {pipeline_mode = #tpu.pipeline_mode<synchronous>, transform_indices = @transform_3, window_bounds = array<i64: 32, 96>}, {pipeline_mode = #tpu.pipeline_mode<synchronous>, transform_indices = @transform_4, window_bounds = array<i64: 1, 96>}, {pipeline_mode = #tpu.pipeline_mode<synchronous>, transform_indices = @transform_5, window_bounds = array<i64: 32, 32>}, {pipeline_mode = #tpu.pipeline_mode<synchronous>, transform_indices = @transform_6, window_bounds = array<i64: 1, 32>}, {pipeline_mode = #tpu.pipeline_mode<synchronous>, transform_indices = @transform_7, window_bounds = array<i64: 8, 32>}, {pipeline_mode = #tpu.pipeline_mode<synchronous>, transform_indices = @transform_8, window_bounds = array<i64: 8, 32>}, {pipeline_mode = #tpu.pipeline_mode<synchronous>, transform_indices = @transform_9, window_bounds = array<i64: 1, 32>}, {pipeline_mode = #tpu.pipeline_mode<synchronous>, transform_indices = @transform_10, window_bounds = array<i64: 1, 32>}, {pipeline_mode = #tpu.pipeline_mode<synchronous>, transform_indices = @transform_11, window_bounds = array<i64: 32, 128>}, {pipeline_mode = #tpu.pipeline_mode<synchronous>, transform_indices = @transform_12, window_bounds = array<i64: 1, 128>}, {pipeline_mode = #tpu.pipeline_mode<synchronous>, transform_indices = @transform_13, window_bounds = array<i64: 128, 32>}, {pipeline_mode = #tpu.pipeline_mode<synchronous>, transform_indices = @transform_14, window_bounds = array<i64: 1, 32>}, {transform_indices = @transform_15, window_bounds = array<i64: 8, 32>}]} {
    %c0 = arith.constant 0 : index
    %c0_0 = arith.constant 0 : index
    %0 = vector.load %arg1[%c0, %c0_0] : memref<8x32xf32, #tpu.memory_space<vmem>>, vector<8x32xf32>
    %cst = arith.constant dense<0.000000e+00> : vector<8xf32>
    %1 = vector.multi_reduction <add>, %0, %cst [1] : vector<8x32xf32> to vector<8xf32>
    %2 = vector.shape_cast %1 : vector<8xf32> to vector<8x1xf32>
    %cst_1 = arith.constant 3.200000e+01 : f32
    %3 = vector.broadcast %cst_1 : f32 to vector<8x1xf32>
    %4 = arith.divf %2, %3 : vector<8x1xf32>
    %5 = vector.broadcast %4 : vector<8x1xf32> to vector<8x32xf32>
    %6 = arith.subf %0, %5 : vector<8x32xf32>
    %7 = arith.mulf %6, %6 : vector<8x32xf32>
    %cst_2 = arith.constant dense<0.000000e+00> : vector<8xf32>
    %8 = vector.multi_reduction <add>, %7, %cst_2 [1] : vector<8x32xf32> to vector<8xf32>
    %9 = vector.shape_cast %8 : vector<8xf32> to vector<8x1xf32>
    %cst_3 = arith.constant 3.200000e+01 : f32
    %10 = vector.broadcast %cst_3 : f32 to vector<8x1xf32>
    %11 = arith.divf %9, %10 : vector<8x1xf32>
    %12 = vector.broadcast %4 : vector<8x1xf32> to vector<8x32xf32>
    %13 = arith.subf %0, %12 : vector<8x32xf32>
    %cst_4 = arith.constant 9.99999974E-6 : f32
    %14 = vector.broadcast %cst_4 : f32 to vector<8x1xf32>
    %15 = arith.addf %11, %14 : vector<8x1xf32>
    %16 = math.rsqrt %15 : vector<8x1xf32>
    %17 = vector.broadcast %16 : vector<8x1xf32> to vector<8x32xf32>
    %18 = arith.mulf %13, %17 : vector<8x32xf32>
    %c0_5 = arith.constant 0 : index
    %c0_6 = arith.constant 0 : index
    %19 = vector.load %arg2[%c0_5, %c0_6] : memref<1x32xf32, #tpu.memory_space<vmem>>, vector<1x32xf32>
    %20 = vector.broadcast %19 : vector<1x32xf32> to vector<8x32xf32>
    %21 = arith.mulf %18, %20 : vector<8x32xf32>
    %c0_7 = arith.constant 0 : index
    %c0_8 = arith.constant 0 : index
    %22 = vector.load %arg3[%c0_7, %c0_8] : memref<1x32xf32, #tpu.memory_space<vmem>>, vector<1x32xf32>
    %23 = vector.broadcast %22 : vector<1x32xf32> to vector<8x32xf32>
    %24 = arith.addf %21, %23 : vector<8x32xf32>
    %c0_9 = arith.constant 0 : index
    %c0_10 = arith.constant 0 : index
    %25 = vector.load %arg4[%c0_9, %c0_10] : memref<32x96xf32, #tpu.memory_space<vmem>>, vector<32x96xf32>
    %cst_11 = arith.constant dense<0.000000e+00> : vector<8x96xf32>
    %26 = tpu.matmul %24, %25, %cst_11 {dimension_numbers = #tpu.dot_dimension_numbers<[1], [0], [0], [1], [0, 0, 1, 1], [], []>} : vector<8x32xf32>, vector<32x96xf32>, vector<8x96xf32> -> vector<8x96xf32>
    %c0_12 = arith.constant 0 : index
    %c0_13 = arith.constant 0 : index
    %27 = vector.load %arg5[%c0_12, %c0_13] : memref<1x96xf32, #tpu.memory_space<vmem>>, vector<1x96xf32>
    %28 = vector.broadcast %27 : vector<1x96xf32> to vector<8x96xf32>
    %29 = arith.addf %26, %28 : vector<8x96xf32>
    %30 = vector.extract_strided_slice %29 {offsets = [0, 0], sizes = [8, 32], strides = [1, 1]} : vector<8x96xf32> to vector<8x32xf32>
    %31 = vector.extract_strided_slice %29 {offsets = [0, 32], sizes = [8, 32], strides = [1, 1]} : vector<8x96xf32> to vector<8x32xf32>
    %32 = vector.extract_strided_slice %29 {offsets = [0, 64], sizes = [8, 32], strides = [1, 1]} : vector<8x96xf32> to vector<8x32xf32>
    %c0_14 = arith.constant 0 : index
    %c0_15 = arith.constant 0 : index
    %33 = vector.load %arg8[%c0_14, %c0_15] : memref<8x32xf32, #tpu.memory_space<vmem>>, vector<8x32xf32>
    %c0_16 = arith.constant 0 : index
    %c0_17 = arith.constant 0 : index
    %34 = vector.load %arg9[%c0_16, %c0_17] : memref<8x32xf32, #tpu.memory_space<vmem>>, vector<8x32xf32>
    %35 = vector.extract_strided_slice %30 {offsets = [0, 16], sizes = [8, 16], strides = [1, 1]} : vector<8x32xf32> to vector<8x16xf32>
    %36 = vector.extract_strided_slice %30 {offsets = [0, 0], sizes = [8, 16], strides = [1, 1]} : vector<8x32xf32> to vector<8x16xf32>
    %37 = tpu.concatenate %35, %36 in 1 : vector<8x16xf32>, vector<8x16xf32> -> vector<8x32xf32>
    %38 = arith.mulf %30, %33 : vector<8x32xf32>
    %39 = arith.mulf %37, %34 : vector<8x32xf32>
    %40 = arith.addf %38, %39 : vector<8x32xf32>
    %cst_18 = arith.constant 0.353553385 : f32
    %41 = vector.broadcast %cst_18 : f32 to vector<8x32xf32>
    %42 = arith.mulf %40, %41 : vector<8x32xf32>
    %43 = vector.extract_strided_slice %31 {offsets = [0, 16], sizes = [8, 16], strides = [1, 1]} : vector<8x32xf32> to vector<8x16xf32>
    %44 = vector.extract_strided_slice %31 {offsets = [0, 0], sizes = [8, 16], strides = [1, 1]} : vector<8x32xf32> to vector<8x16xf32>
    %45 = tpu.concatenate %43, %44 in 1 : vector<8x16xf32>, vector<8x16xf32> -> vector<8x32xf32>
    %46 = arith.mulf %31, %33 : vector<8x32xf32>
    %47 = arith.mulf %45, %34 : vector<8x32xf32>
    %48 = arith.addf %46, %47 : vector<8x32xf32>
    %49 = tpu.iota {dimensions = array<i32: 0>} : vector<8x8xi32>
    %50 = tpu.iota {dimensions = array<i32: 1>} : vector<8x8xi32>
    %51 = arith.cmpi sle, %50, %49 : vector<8x8xi32>
    %52 = vector.extract_strided_slice %42 {offsets = [0, 0], sizes = [8, 8], strides = [1, 1]} : vector<8x32xf32> to vector<8x8xf32>
    %53 = vector.extract_strided_slice %48 {offsets = [0, 0], sizes = [8, 8], strides = [1, 1]} : vector<8x32xf32> to vector<8x8xf32>
    %54 = tpu.transpose %53, [1, 0] : vector<8x8xf32> -> vector<8x8xf32>
    %cst_19 = arith.constant dense<0.000000e+00> : vector<8x8xf32>
    %55 = tpu.matmul %52, %54, %cst_19 {dimension_numbers = #tpu.dot_dimension_numbers<[1], [0], [0], [1], [0, 0, 1, 1], [], []>} : vector<8x8xf32>, vector<8x8xf32>, vector<8x8xf32> -> vector<8x8xf32>
    %cst_20 = arith.constant -1.000000e+30 : f32
    %56 = vector.broadcast %cst_20 : f32 to vector<8x8xf32>
    %57 = arith.select %51, %55, %56 : vector<8x8xi1>, vector<8x8xf32>
    %cst_21 = arith.constant dense<0xFF800000> : vector<8xf32>
    %58 = vector.multi_reduction <maximumf>, %57, %cst_21 [1] : vector<8x8xf32> to vector<8xf32>
    %59 = vector.shape_cast %58 : vector<8xf32> to vector<8x1xf32>
    %60 = vector.broadcast %59 : vector<8x1xf32> to vector<8x8xf32>
    %61 = arith.subf %57, %60 : vector<8x8xf32>
    %62 = math.exp %61 : vector<8x8xf32>
    %cst_22 = arith.constant dense<0.000000e+00> : vector<8xf32>
    %63 = vector.multi_reduction <add>, %62, %cst_22 [1] : vector<8x8xf32> to vector<8xf32>
    %64 = vector.shape_cast %63 : vector<8xf32> to vector<8x1xf32>
    %65 = tpu.reciprocal %64 {approx = true} : vector<8x1xf32> -> vector<8x1xf32>
    %66 = vector.extract_strided_slice %32 {offsets = [0, 0], sizes = [8, 8], strides = [1, 1]} : vector<8x32xf32> to vector<8x8xf32>
    %cst_23 = arith.constant dense<0.000000e+00> : vector<8x8xf32>
    %67 = tpu.matmul %62, %66, %cst_23 {dimension_numbers = #tpu.dot_dimension_numbers<[1], [0], [0], [1], [0, 0, 1, 1], [], []>} : vector<8x8xf32>, vector<8x8xf32>, vector<8x8xf32> -> vector<8x8xf32>
    %68 = vector.broadcast %65 : vector<8x1xf32> to vector<8x8xf32>
    %69 = arith.mulf %67, %68 : vector<8x8xf32>
    %c0_24 = arith.constant 0 : index
    %c0_25 = arith.constant 0 : index
    %70 = vector.load %arg17[%c0_24, %c0_25] : memref<8x32xf32, #tpu.memory_space<vmem>>, vector<8x8xf32>
    tpu.vector_store %arg17[%c0_24, %c0_25], %69 {strides = array<i32>} : memref<8x32xf32, #tpu.memory_space<vmem>>, vector<8x8xf32>,
    %71 = vector.extract_strided_slice %42 {offsets = [0, 8], sizes = [8, 8], strides = [1, 1]} : vector<8x32xf32> to vector<8x8xf32>
    %72 = vector.extract_strided_slice %48 {offsets = [0, 8], sizes = [8, 8], strides = [1, 1]} : vector<8x32xf32> to vector<8x8xf32>
    %73 = tpu.transpose %72, [1, 0] : vector<8x8xf32> -> vector<8x8xf32>
    %cst_26 = arith.constant dense<0.000000e+00> : vector<8x8xf32>
    %74 = tpu.matmul %71, %73, %cst_26 {dimension_numbers = #tpu.dot_dimension_numbers<[1], [0], [0], [1], [0, 0, 1, 1], [], []>} : vector<8x8xf32>, vector<8x8xf32>, vector<8x8xf32> -> vector<8x8xf32>
    %cst_27 = arith.constant -1.000000e+30 : f32
    %75 = vector.broadcast %cst_27 : f32 to vector<8x8xf32>
    %76 = arith.select %51, %74, %75 : vector<8x8xi1>, vector<8x8xf32>
    %cst_28 = arith.constant dense<0xFF800000> : vector<8xf32>
    %77 = vector.multi_reduction <maximumf>, %76, %cst_28 [1] : vector<8x8xf32> to vector<8xf32>
    %78 = vector.shape_cast %77 : vector<8xf32> to vector<8x1xf32>
    %79 = vector.broadcast %78 : vector<8x1xf32> to vector<8x8xf32>
    %80 = arith.subf %76, %79 : vector<8x8xf32>
    %81 = math.exp %80 : vector<8x8xf32>
    %cst_29 = arith.constant dense<0.000000e+00> : vector<8xf32>
    %82 = vector.multi_reduction <add>, %81, %cst_29 [1] : vector<8x8xf32> to vector<8xf32>
    %83 = vector.shape_cast %82 : vector<8xf32> to vector<8x1xf32>
    %84 = tpu.reciprocal %83 {approx = true} : vector<8x1xf32> -> vector<8x1xf32>
    %85 = vector.extract_strided_slice %32 {offsets = [0, 8], sizes = [8, 8], strides = [1, 1]} : vector<8x32xf32> to vector<8x8xf32>
    %cst_30 = arith.constant dense<0.000000e+00> : vector<8x8xf32>
    %86 = tpu.matmul %81, %85, %cst_30 {dimension_numbers = #tpu.dot_dimension_numbers<[1], [0], [0], [1], [0, 0, 1, 1], [], []>} : vector<8x8xf32>, vector<8x8xf32>, vector<8x8xf32> -> vector<8x8xf32>
    %87 = vector.broadcast %84 : vector<8x1xf32> to vector<8x8xf32>
    %88 = arith.mulf %86, %87 : vector<8x8xf32>
    %c0_31 = arith.constant 0 : index
    %c8 = arith.constant 8 : index
    %89 = vector.load %arg17[%c0_31, %c8] : memref<8x32xf32, #tpu.memory_space<vmem>>, vector<8x8xf32>
    tpu.vector_store %arg17[%c0_31, %c8], %88 {strides = array<i32>} : memref<8x32xf32, #tpu.memory_space<vmem>>, vector<8x8xf32>,
    %90 = vector.extract_strided_slice %42 {offsets = [0, 16], sizes = [8, 8], strides = [1, 1]} : vector<8x32xf32> to vector<8x8xf32>
    %91 = vector.extract_strided_slice %48 {offsets = [0, 16], sizes = [8, 8], strides = [1, 1]} : vector<8x32xf32> to vector<8x8xf32>
    %92 = tpu.transpose %91, [1, 0] : vector<8x8xf32> -> vector<8x8xf32>
    %cst_32 = arith.constant dense<0.000000e+00> : vector<8x8xf32>
    %93 = tpu.matmul %90, %92, %cst_32 {dimension_numbers = #tpu.dot_dimension_numbers<[1], [0], [0], [1], [0, 0, 1, 1], [], []>} : vector<8x8xf32>, vector<8x8xf32>, vector<8x8xf32> -> vector<8x8xf32>
    %cst_33 = arith.constant -1.000000e+30 : f32
    %94 = vector.broadcast %cst_33 : f32 to vector<8x8xf32>
    %95 = arith.select %51, %93, %94 : vector<8x8xi1>, vector<8x8xf32>
    %cst_34 = arith.constant dense<0xFF800000> : vector<8xf32>
    %96 = vector.multi_reduction <maximumf>, %95, %cst_34 [1] : vector<8x8xf32> to vector<8xf32>
    %97 = vector.shape_cast %96 : vector<8xf32> to vector<8x1xf32>
    %98 = vector.broadcast %97 : vector<8x1xf32> to vector<8x8xf32>
    %99 = arith.subf %95, %98 : vector<8x8xf32>
    %100 = math.exp %99 : vector<8x8xf32>
    %cst_35 = arith.constant dense<0.000000e+00> : vector<8xf32>
    %101 = vector.multi_reduction <add>, %100, %cst_35 [1] : vector<8x8xf32> to vector<8xf32>
    %102 = vector.shape_cast %101 : vector<8xf32> to vector<8x1xf32>
    %103 = tpu.reciprocal %102 {approx = true} : vector<8x1xf32> -> vector<8x1xf32>
    %104 = vector.extract_strided_slice %32 {offsets = [0, 16], sizes = [8, 8], strides = [1, 1]} : vector<8x32xf32> to vector<8x8xf32>
    %cst_36 = arith.constant dense<0.000000e+00> : vector<8x8xf32>
    %105 = tpu.matmul %100, %104, %cst_36 {dimension_numbers = #tpu.dot_dimension_numbers<[1], [0], [0], [1], [0, 0, 1, 1], [], []>} : vector<8x8xf32>, vector<8x8xf32>, vector<8x8xf32> -> vector<8x8xf32>
    %106 = vector.broadcast %103 : vector<8x1xf32> to vector<8x8xf32>
    %107 = arith.mulf %105, %106 : vector<8x8xf32>
    %c0_37 = arith.constant 0 : index
    %c16 = arith.constant 16 : index
    %108 = vector.load %arg17[%c0_37, %c16] : memref<8x32xf32, #tpu.memory_space<vmem>>, vector<8x8xf32>
    tpu.vector_store %arg17[%c0_37, %c16], %107 {strides = array<i32>} : memref<8x32xf32, #tpu.memory_space<vmem>>, vector<8x8xf32>,
    %109 = vector.extract_strided_slice %42 {offsets = [0, 24], sizes = [8, 8], strides = [1, 1]} : vector<8x32xf32> to vector<8x8xf32>
    %110 = vector.extract_strided_slice %48 {offsets = [0, 24], sizes = [8, 8], strides = [1, 1]} : vector<8x32xf32> to vector<8x8xf32>
    %111 = tpu.transpose %110, [1, 0] : vector<8x8xf32> -> vector<8x8xf32>
    %cst_38 = arith.constant dense<0.000000e+00> : vector<8x8xf32>
    %112 = tpu.matmul %109, %111, %cst_38 {dimension_numbers = #tpu.dot_dimension_numbers<[1], [0], [0], [1], [0, 0, 1, 1], [], []>} : vector<8x8xf32>, vector<8x8xf32>, vector<8x8xf32> -> vector<8x8xf32>
    %cst_39 = arith.constant -1.000000e+30 : f32
    %113 = vector.broadcast %cst_39 : f32 to vector<8x8xf32>
    %114 = arith.select %51, %112, %113 : vector<8x8xi1>, vector<8x8xf32>
    %cst_40 = arith.constant dense<0xFF800000> : vector<8xf32>
    %115 = vector.multi_reduction <maximumf>, %114, %cst_40 [1] : vector<8x8xf32> to vector<8xf32>
    %116 = vector.shape_cast %115 : vector<8xf32> to vector<8x1xf32>
    %117 = vector.broadcast %116 : vector<8x1xf32> to vector<8x8xf32>
    %118 = arith.subf %114, %117 : vector<8x8xf32>
    %119 = math.exp %118 : vector<8x8xf32>
    %cst_41 = arith.constant dense<0.000000e+00> : vector<8xf32>
    %120 = vector.multi_reduction <add>, %119, %cst_41 [1] : vector<8x8xf32> to vector<8xf32>
    %121 = vector.shape_cast %120 : vector<8xf32> to vector<8x1xf32>
    %122 = tpu.reciprocal %121 {approx = true} : vector<8x1xf32> -> vector<8x1xf32>
    %123 = vector.extract_strided_slice %32 {offsets = [0, 24], sizes = [8, 8], strides = [1, 1]} : vector<8x32xf32> to vector<8x8xf32>
    %cst_42 = arith.constant dense<0.000000e+00> : vector<8x8xf32>
    %124 = tpu.matmul %119, %123, %cst_42 {dimension_numbers = #tpu.dot_dimension_numbers<[1], [0], [0], [1], [0, 0, 1, 1], [], []>} : vector<8x8xf32>, vector<8x8xf32>, vector<8x8xf32> -> vector<8x8xf32>
    %125 = vector.broadcast %122 : vector<8x1xf32> to vector<8x8xf32>
    %126 = arith.mulf %124, %125 : vector<8x8xf32>
    %c0_43 = arith.constant 0 : index
    %c24 = arith.constant 24 : index
    %127 = vector.load %arg17[%c0_43, %c24] : memref<8x32xf32, #tpu.memory_space<vmem>>, vector<8x8xf32>
    tpu.vector_store %arg17[%c0_43, %c24], %126 {strides = array<i32>} : memref<8x32xf32, #tpu.memory_space<vmem>>, vector<8x8xf32>,
    %c0_44 = arith.constant 0 : index
    %c0_45 = arith.constant 0 : index
    %128 = vector.load %arg17[%c0_44, %c0_45] : memref<8x32xf32, #tpu.memory_space<vmem>>, vector<8x32xf32>
    %c0_46 = arith.constant 0 : index
    %c0_47 = arith.constant 0 : index
    %129 = vector.load %arg6[%c0_46, %c0_47] : memref<32x32xf32, #tpu.memory_space<vmem>>, vector<32x32xf32>
    %cst_48 = arith.constant dense<0.000000e+00> : vector<8x32xf32>
    %130 = tpu.matmul %128, %129, %cst_48 {dimension_numbers = #tpu.dot_dimension_numbers<[1], [0], [0], [1], [0, 0, 1, 1], [], []>} : vector<8x32xf32>, vector<32x32xf32>, vector<8x32xf32> -> vector<8x32xf32>
    %c0_49 = arith.constant 0 : index
    %c0_50 = arith.constant 0 : index
    %131 = vector.load %arg7[%c0_49, %c0_50] : memref<1x32xf32, #tpu.memory_space<vmem>>, vector<1x32xf32>
    %132 = vector.broadcast %131 : vector<1x32xf32> to vector<8x32xf32>
    %133 = arith.addf %130, %132 : vector<8x32xf32>
    %134 = arith.addf %24, %133 : vector<8x32xf32>
    %cst_51 = arith.constant dense<0.000000e+00> : vector<8xf32>
    %135 = vector.multi_reduction <add>, %134, %cst_51 [1] : vector<8x32xf32> to vector<8xf32>
    %136 = vector.shape_cast %135 : vector<8xf32> to vector<8x1xf32>
    %cst_52 = arith.constant 3.200000e+01 : f32
    %137 = vector.broadcast %cst_52 : f32 to vector<8x1xf32>
    %138 = arith.divf %136, %137 : vector<8x1xf32>
    %139 = vector.broadcast %138 : vector<8x1xf32> to vector<8x32xf32>
    %140 = arith.subf %134, %139 : vector<8x32xf32>
    %141 = arith.mulf %140, %140 : vector<8x32xf32>
    %cst_53 = arith.constant dense<0.000000e+00> : vector<8xf32>
    %142 = vector.multi_reduction <add>, %141, %cst_53 [1] : vector<8x32xf32> to vector<8xf32>
    %143 = vector.shape_cast %142 : vector<8xf32> to vector<8x1xf32>
    %cst_54 = arith.constant 3.200000e+01 : f32
    %144 = vector.broadcast %cst_54 : f32 to vector<8x1xf32>
    %145 = arith.divf %143, %144 : vector<8x1xf32>
    %146 = vector.broadcast %138 : vector<8x1xf32> to vector<8x32xf32>
    %147 = arith.subf %134, %146 : vector<8x32xf32>
    %cst_55 = arith.constant 9.99999974E-6 : f32
    %148 = vector.broadcast %cst_55 : f32 to vector<8x1xf32>
    %149 = arith.addf %145, %148 : vector<8x1xf32>
    %150 = math.rsqrt %149 : vector<8x1xf32>
    %151 = vector.broadcast %150 : vector<8x1xf32> to vector<8x32xf32>
    %152 = arith.mulf %147, %151 : vector<8x32xf32>
    %c0_56 = arith.constant 0 : index
    %c0_57 = arith.constant 0 : index
    %153 = vector.load %arg10[%c0_56, %c0_57] : memref<1x32xf32, #tpu.memory_space<vmem>>, vector<1x32xf32>
    %154 = vector.broadcast %153 : vector<1x32xf32> to vector<8x32xf32>
    %155 = arith.mulf %152, %154 : vector<8x32xf32>
    %c0_58 = arith.constant 0 : index
    %c0_59 = arith.constant 0 : index
    %156 = vector.load %arg11[%c0_58, %c0_59] : memref<1x32xf32, #tpu.memory_space<vmem>>, vector<1x32xf32>
    %157 = vector.broadcast %156 : vector<1x32xf32> to vector<8x32xf32>
    %158 = arith.addf %155, %157 : vector<8x32xf32>
    %c0_60 = arith.constant 0 : index
    %c0_61 = arith.constant 0 : index
    %159 = vector.load %arg12[%c0_60, %c0_61] : memref<32x128xf32, #tpu.memory_space<vmem>>, vector<32x128xf32>
    %cst_62 = arith.constant dense<0.000000e+00> : vector<8x128xf32>
    %160 = tpu.matmul %158, %159, %cst_62 {dimension_numbers = #tpu.dot_dimension_numbers<[1], [0], [0], [1], [0, 0, 1, 1], [], []>} : vector<8x32xf32>, vector<32x128xf32>, vector<8x128xf32> -> vector<8x128xf32>
    %c0_63 = arith.constant 0 : index
    %c0_64 = arith.constant 0 : index
    %161 = vector.load %arg13[%c0_63, %c0_64] : memref<1x128xf32, #tpu.memory_space<vmem>>, vector<1x128xf32>
    %162 = vector.broadcast %161 : vector<1x128xf32> to vector<8x128xf32>
    %163 = arith.addf %160, %162 : vector<8x128xf32>
    %cst_65 = arith.constant 5.000000e-01 : f32
    %164 = vector.broadcast %cst_65 : f32 to vector<8x128xf32>
    %165 = arith.mulf %164, %163 : vector<8x128xf32>
    %cst_66 = arith.constant 0.707106769 : f32
    %166 = vector.broadcast %cst_66 : f32 to vector<8x128xf32>
    %167 = arith.mulf %163, %166 : vector<8x128xf32>
    %168 = math.erf %167 : vector<8x128xf32>
    %cst_67 = arith.constant 1.000000e+00 : f32
    %169 = vector.broadcast %cst_67 : f32 to vector<8x128xf32>
    %170 = arith.addf %169, %168 : vector<8x128xf32>
    %171 = arith.mulf %165, %170 : vector<8x128xf32>
    %c0_68 = arith.constant 0 : index
    %c0_69 = arith.constant 0 : index
    %172 = vector.load %arg14[%c0_68, %c0_69] : memref<128x32xf32, #tpu.memory_space<vmem>>, vector<128x32xf32>
    %cst_70 = arith.constant dense<0.000000e+00> : vector<8x32xf32>
    %173 = tpu.matmul %171, %172, %cst_70 {dimension_numbers = #tpu.dot_dimension_numbers<[1], [0], [0], [1], [0, 0, 1, 1], [], []>} : vector<8x128xf32>, vector<128x32xf32>, vector<8x32xf32> -> vector<8x32xf32>
    %c0_71 = arith.constant 0 : index
    %c0_72 = arith.constant 0 : index
    %174 = vector.load %arg15[%c0_71, %c0_72] : memref<1x32xf32, #tpu.memory_space<vmem>>, vector<1x32xf32>
    %175 = vector.broadcast %174 : vector<1x32xf32> to vector<8x32xf32>
    %176 = arith.addf %173, %175 : vector<8x32xf32>
    %177 = arith.addf %158, %176 : vector<8x32xf32>
    %c0_73 = arith.constant 0 : index
    %c0_74 = arith.constant 0 : index
    %178 = vector.load %arg16[%c0_73, %c0_74] : memref<8x32xf32, #tpu.memory_space<vmem>>, vector<8x32xf32>
    tpu.vector_store %arg16[%c0_73, %c0_74], %177 {strides = array<i32>} : memref<8x32xf32, #tpu.memory_space<vmem>>, vector<8x32xf32>,
    return
  }
  func.func @transform_0(%arg0: i32) -> (i32, i32) {
    %c0_i32 = arith.constant 0 : i32
    %c0_i32_0 = arith.constant 0 : i32
    return %arg0, %c0_i32 : i32, i32
  }
  func.func @transform_1(%arg0: i32) -> (i32, i32) {
    %c0_i32 = arith.constant 0 : i32
    %c0_i32_0 = arith.constant 0 : i32
    %c0_i32_1 = arith.constant 0 : i32
    return %c0_i32, %c0_i32_0 : i32, i32
  }
  func.func @transform_2(%arg0: i32) -> (i32, i32) {
    %c0_i32 = arith.constant 0 : i32
    %c0_i32_0 = arith.constant 0 : i32
    %c0_i32_1 = arith.constant 0 : i32
    return %c0_i32, %c0_i32_0 : i32, i32
  }
  func.func @transform_3(%arg0: i32) -> (i32, i32) {
    %c0_i32 = arith.constant 0 : i32
    %c0_i32_0 = arith.constant 0 : i32
    %c0_i32_1 = arith.constant 0 : i32
    return %c0_i32, %c0_i32_0 : i32, i32
  }
  func.func @transform_4(%arg0: i32) -> (i32, i32) {
    %c0_i32 = arith.constant 0 : i32
    %c0_i32_0 = arith.constant 0 : i32
    %c0_i32_1 = arith.constant 0 : i32
    return %c0_i32, %c0_i32_0 : i32, i32
  }
  func.func @transform_5(%arg0: i32) -> (i32, i32) {
    %c0_i32 = arith.constant 0 : i32
    %c0_i32_0 = arith.constant 0 : i32
    %c0_i32_1 = arith.constant 0 : i32
    return %c0_i32, %c0_i32_0 : i32, i32
  }
  func.func @transform_6(%arg0: i32) -> (i32, i32) {
    %c0_i32 = arith.constant 0 : i32
    %c0_i32_0 = arith.constant 0 : i32
    %c0_i32_1 = arith.constant 0 : i32
    return %c0_i32, %c0_i32_0 : i32, i32
  }
  func.func @transform_7(%arg0: i32) -> (i32, i32) {
    %c0_i32 = arith.constant 0 : i32
    %c0_i32_0 = arith.constant 0 : i32
    %c0_i32_1 = arith.constant 0 : i32
    return %c0_i32, %c0_i32_0 : i32, i32
  }
  func.func @transform_8(%arg0: i32) -> (i32, i32) {
    %c0_i32 = arith.constant 0 : i32
    %c0_i32_0 = arith.constant 0 : i32
    %c0_i32_1 = arith.constant 0 : i32
    return %c0_i32, %c0_i32_0 : i32, i32
  }
  func.func @transform_9(%arg0: i32) -> (i32, i32) {
    %c0_i32 = arith.constant 0 : i32
    %c0_i32_0 = arith.constant 0 : i32
    %c0_i32_1 = arith.constant 0 : i32
    return %c0_i32, %c0_i32_0 : i32, i32
  }
  func.func @transform_10(%arg0: i32) -> (i32, i32) {
    %c0_i32 = arith.constant 0 : i32
    %c0_i32_0 = arith.constant 0 : i32
    %c0_i32_1 = arith.constant 0 : i32
    return %c0_i32, %c0_i32_0 : i32, i32
  }
  func.func @transform_11(%arg0: i32) -> (i32, i32) {
    %c0_i32 = arith.constant 0 : i32
    %c0_i32_0 = arith.constant 0 : i32
    %c0_i32_1 = arith.constant 0 : i32
    return %c0_i32, %c0_i32_0 : i32, i32
  }
  func.func @transform_12(%arg0: i32) -> (i32, i32) {
    %c0_i32 = arith.constant 0 : i32
    %c0_i32_0 = arith.constant 0 : i32
    %c0_i32_1 = arith.constant 0 : i32
    return %c0_i32, %c0_i32_0 : i32, i32
  }
  func.func @transform_13(%arg0: i32) -> (i32, i32) {
    %c0_i32 = arith.constant 0 : i32
    %c0_i32_0 = arith.constant 0 : i32
    %c0_i32_1 = arith.constant 0 : i32
    return %c0_i32, %c0_i32_0 : i32, i32
  }
  func.func @transform_14(%arg0: i32) -> (i32, i32) {
    %c0_i32 = arith.constant 0 : i32
    %c0_i32_0 = arith.constant 0 : i32
    %c0_i32_1 = arith.constant 0 : i32
    return %c0_i32, %c0_i32_0 : i32, i32
  }
  func.func @transform_15(%arg0: i32) -> (i32, i32) {
    %c0_i32 = arith.constant 0 : i32
    %c0_i32_0 = arith.constant 0 : i32
    return %arg0, %c0_i32 : i32, i32
  }
}

</mosaic_0001>

<bundles_post_ra>
// kernel: tpu_custom_call.1
= control target key start
LH: loop header
LB: loop body
LE: loop exit
PB: predicated region body
PF: predicated region fallthrough
CT: control target
= control target key end

     0   :  { %s1670_s0 = inlined_call_operand.vmem [shape: f32[16,32], index: 0, kind: input, shape index: {}]   ;;  %s1671_s1 = inlined_call_operand.vmem [shape: f32[1,32], index: 1, kind: input, shape index: {}]   ;;  %s1672_s2 = inlined_call_operand.vmem [shape: f32[1,32], index: 2, kind: input, shape index: {}]   ;;  %s1673_s3 = inlined_call_operand.vmem [shape: f32[32,96], index: 3, kind: input, shape index: {}]   ;;  %s1674_s4 = inlined_call_operand.vmem [shape: f32[1,96], index: 4, kind: input, shape index: {}]   ;;  %s1675_s5 = inlined_call_operand.vmem [shape: f32[32,32], index: 5, kind: input, shape index: {}]   ;;  %s1676_s6 = inlined_call_operand.vmem [shape: f32[1,32], index: 6, kind: input, shape index: {}]   ;;  %s1677_s7 = inlined_call_operand.vmem [shape: f32[8,32], index: 7, kind: input, shape index: {}]   ;;  %s1678_s8 = inlined_call_operand.vmem [shape: f32[8,32], index: 8, kind: input, shape index: {}]   ;;  %s1679_s9 = inlined_call_operand.vmem [shape: f32[1,32], index: 9, kind: input, shape index: {}]   ;;  %s1680_s10 = inlined_call_operand.vmem [shape: f32[1,32], index: 10, kind: input, shape index: {}]   ;;  %s1681_s11 = inlined_call_operand.vmem [shape: f32[32,128], index: 11, kind: input, shape index: {}]   ;;  %s1682_s12 = inlined_call_operand.vmem [shape: f32[1,128], index: 12, kind: input, shape index: {}]   ;;  %s1683_s13 = inlined_call_operand.vmem [shape: f32[128,32], index: 13, kind: input, shape index: {}]   ;;  %s1684_s14 = inlined_call_operand.vmem [shape: f32[1,32], index: 14, kind: input, shape index: {}]   ;;  %s1685_s15 = inlined_call_operand.hbm [shape: f32[16,32], index: 15, kind: output, shape index: {}]  }
   0x1   :  { %1689 = sst [smem:[#allocation9_spill]] %s1670_s0 }
   0x2   :  { %1690 = sst [smem:[#allocation10_spill]] %s1671_s1 }
   0x3   :  { %1691 = sst [smem:[#allocation11_spill]] %s1672_s2 }
   0x4   :  { %20 = vsyncpa [#allocation4], 0 }
   0x5   :  { %22 = vsyncpa [#allocation4 + $0x1], 0  ;;  %s1411_s18 = smov 0   ;;  %s1413_s19 = smov 0  }
   0x6   :  { %s1415_s20 = smov 0   ;;  %s1417_s21 = smov 0  }
   0x7 LB: > { %1692 = sst [smem:[#allocation6_spill]] %s1309_s20  ;;  %s1432_s22 = sadd.s32 4294967295, %s1313_s21   ;;  %s1313_s21 = sphi %s1417_s21, %s1700_s21   ;;  %s1309_s20 = sphi %s1415_s20, %s1702_s20   ;;  %s1305_s19 = sphi %s1413_s19, %s1704_s19   ;;  %s1301_s18 = sphi %s1411_s18, %s1703_s18  }
   0x8   : > { %s1138_s23 = sadd.s32 4294967294, %s1313_s21   ;;  %s1436_s24 = sadd.s32 1, %s1313_s21  }
   0x9   : > { %1693 = sst [smem:[#allocation7_spill]] %s1436_s24  ;;  %s355_s25 = sadd.s32 1, %s1309_s20 }
   0xa   : > { %s352_s26 = ssub.s32 %s1313_s21, %s1436_s24  ;;  %p365_p0 = scmp.ne.s32.totalorder %s1309_s20, %s1305_s19 }
   0xb   : > { %p353_p1 = scmp.eq.s32.totalorder %s352_s26, 0  ;;  %p366_p2 = scmp.eq.s32.totalorder %s1432_s22, 1 }
   0xc   : > { %p371_p3 = scmp.ne.s32.totalorder %s1305_s19, %s1301_s18  ;;  %p372_p4 = scmp.eq.s32.totalorder %s1138_s23, 1 }
   0xd   : > { %s1447_s27 = scalar_select %p353_p1, %s1309_s20, %s355_s25  }
   0xe   : > { %p1449_p5 = por %p366_p2, %p365_p0  ;;  %p1453_p6 = por %p372_p4, %p371_p3 }
   0xf   : > { %1694 = sst [smem:[#allocation8_spill]] %s1447_s27  ;;  %p1141_p7 = scmp.ge.s32.totalorder %s1313_s21, 1 }
  0x10   : > { %p439_p8 = scmp.lt.s32.totalorder %s1313_s21, 3 }
  0x12   : > { %p440_p9 = pnand %p1141_p7, %p439_p8 }
  0x13   : > { %p486_p10 = scmp.lt.s32.totalorder (!%p440_p9), %s1432_s22, 1  ;;  %s1697_s0 = sld [smem:[#allocation9_spill]] (!%p440_p9) }
  0x14   : > { %443 = sbr.rel (%p440_p9) target bundleno = 2043 (0x7fb), region = 80  ;;  %s1316_s26 = smov (!%p440_p9), 32  }
  0x15   : > { %s1698_s1 = sld [smem:[#allocation10_spill]] (!%p440_p9)  ;;  %s1317_s17 = smov (!%p440_p9), 16  }
  0x16   : > { %s1699_s2 = sld [smem:[#allocation11_spill]] (!%p440_p9)  ;;  %s1318_s23 = smov (!%p440_p9), 112  }
  0x17   : > { %s1320_s24 = smov (!%p440_p9), 104   ;;  %s1321_s27 = smov (!%p440_p9), 64  }
  0x18   : > { %s1328_s20 = smov (!%p440_p9), 48  }
  0x19   : > { %s487_s30 = scalar_select %p486_p10, %s1432_s22, 1  ;;  %vm491_vm0 = vcmask 261120   ;;  %v1315_v2 = vmov 32.0   ;;  %v534_v14 = vld [vmem:[%s1673_s3 + $0x18] sm:$0xff]  ;;  %v533_v15 = vld [vmem:[%s1673_s3 + $0x10] sm:$0xff]  ;;  %v532_v16 = vld [vmem:[%s1673_s3 + $0x8] sm:$0xff]  ;;  %v592_v60 = vlaneseq }
  0x1a   : > { %1227 = vrcp.f32 %v1315_v2  ;;  %554 = vmatpush.msra.mxu2 %v534_v14  ;;  %v531_v17 = vld [vmem:[%s1673_s3] sm:$0xff]  ;;  %vm571_vm5 = vcmask 130048   ;;  %vm600_vm6 = vcmask 64512   ;;  %vm735_vm8 = vcmask 130112  }
  0x1b   : > { %s1143_s16 = sshll.u32 %s487_s30, 3  ;;  %v562_v18 = vld [vmem:[%s1677_s7] sm:$0xff]  ;;  %s1322_s30 = smov 88   ;;  %v593_v61 = vshrl.u32 %v592_v60, 7  ;;  %v595_v62 = vand.u32 127, %v592_v60  ;;  %vm807_vm9 = vcmask 195712  }
  0x1c   : > { %s489_s25 = scalar_lea.vmem %s1697_s0, %s1143_s16  ;;  %555 = vmatpush.msra.mxu2 %v533_v15  ;;  %582 = vrot.lane.b32.xlu2 %v562_v18, %s1316_s26  ;;  %v1219_v28 = vld [vmem:[%s1698_s1] ss:$0 sm:$0xff]  ;;  %s1323_s16 = smov 96   ;;  %vm879_vm10 = vcmask 261312  }
  0x1d   : > { %v490_v0 = vld [vmem:[%s489_s25] sm:$0xff]  ;;  %s1319_s25 = smov 80   ;;  %s1324_s0 = smov 120   ;;  %vm596_vm7 = vcmp.le.s32.totalorder %v595_v62, %v593_v61 }
  0x1e   : > { %v492_v1 = vsel %vm491_vm0, %v490_v0, 0.0  ;;  %556 = vmatpush.msra.mxu2 %v532_v16  ;;  %v1220_v31 = vld [vmem:[%s1699_s2] ss:$0 sm:$0xff] }
  0x1f   : > { %493 = vadd.xlane.f32.xlu0 %v492_v1  ;;  %v1221_v34 = vld [vmem:[%s1674_s4] ss:$0 sm:$0xff] }
  0x20   : > { %v1228_v3 = vpop.eup %1227  ;;  %557 = vmatpush.msra.mxu2 %v531_v17  ;;  %v563_v40 = vld [vmem:[%s1678_s8] sm:$0xff] }
  0x21   : > { %v496_v4 = vmul.f32 32.0, %v1228_v3  ;;  %vm500_vm1 = vweird.f32 %v1228_v3  ;;  %v1222_v60 = vld [vmem:[%s1676_s6] ss:$0 sm:$0xff] }
  0x23   : > { %v497_v5 = vsub.f32 1.0, %v496_v4 }
  0x25   : > { %v498_v6 = vmul.f32 %v1228_v3, %v497_v5 }
  0x27   : > { %v499_v7 = vadd.f32 %v1228_v3, %v498_v6 }
  0x29   : > { %v1465_v8 = vsel %vm500_vm1, %v1228_v3, %v499_v7 }
  0x76   : > { %v583_v37 = vpop.permute.xlu2 %582 }
  0x92   : > { %v494_v9 = vpop.xlane.xlu0 %493 }
  0x93   : > { %v502_v10 = vmul.f32 %v1465_v8, %v494_v9 }
  0x95   : > { %v503_v11 = vsub.f32 %v490_v0, %v502_v10 }
  0x97   : > { %v504_v12 = vmul.f32 %v503_v11, %v503_v11 }
  0x99   : > { %v505_v13 = vsel %vm491_vm0, %v504_v12, 0.0 }
  0x9a   : > { %506 = vadd.xlane.f32.xlu0 %v505_v13 }
 0x10d   : > { %v507_v19 = vpop.xlane.xlu0 %506 }
 0x10e   : > { %v508_v20 = vmul.f32 %v507_v19, %v1465_v8 }
 0x110   : > { %v509_v21 = vadd.f32 1e-05, %v508_v20 }
 0x112   : > { %1229 = vrsqrt.f32 %v509_v21  ;;  %vm516_vm3 = vweird.f32 %v509_v21 }
 0x118   : > { %v1230_v22 = vpop.eup %1229 }
 0x119   : > { %v511_v23 = vmul.f32 %v1230_v22, %v509_v21  ;;  %vm517_vm2 = vweird.f32 %v1230_v22 }
 0x11a   : > { %vm518_vm4 = vmor %vm516_vm3, %vm517_vm2 }
 0x11b   : > { %v512_v24 = vmul.f32 %v1230_v22, %v511_v23 }
 0x11d   : > { %v513_v25 = vmul.f32 0.5, %v512_v24 }
 0x11f   : > { %v514_v26 = vsub.f32 1.5, %v513_v25 }
 0x121   : > { %v515_v27 = vmul.f32 %v1230_v22, %v514_v26 }
 0x123   : > { %v519_v29 = vsel %vm518_vm4, %v1230_v22, %v515_v27 }
 0x124   : > { %v520_v30 = vmul.f32 %v519_v29, %v503_v11 }
 0x126   : > { %v525_v32 = vmul.f32 %v1219_v28, %v520_v30 }
 0x128   : > { %v1492_v33 = vadd.f32 %v1220_v31, %v525_v32 }
 0x12a   : > { %1144 = vmatmul.msk.f32.vlgmr.msra.gmra.mxu2 %vm491_vm0, %v1492_v33 }
 0x1ad   : > { %v559_v35 = vpop.f32.mrf.mxu2 }
 0x1ae   : > { %v1499_v36 = vadd.f32 %v1221_v34, %v559_v35 }
 0x1b0   : > { %568 = vrot.lane.b32.xlu2 %v1499_v36, %s1317_s17  ;;  %565 = vrot.lane.b32.xlu1 %v1499_v36, %s1318_s23  ;;  %v573_v46 = vmul.f32 %v562_v18, %v1499_v36  ;;  %v585_v49 = vmul.f32 %v583_v37, %v1499_v36 }
 0x1b8   : > { %577 = vrot.lane.b32.xlu1 %v1499_v36, %s1319_s25 }
 0x20a   : > { %v569_v39 = vpop.permute.xlu2 %568 }
 0x222   : > { %v566_v38 = vpop.permute.xlu1 %565 }
 0x223   : > { %v572_v41 = vsel %vm571_vm5, %v566_v38, %v569_v39 }
 0x224   : > { %v574_v44 = vmul.f32 %v572_v41, %v563_v40 }
 0x226   : > { %v575_v47 = vadd.f32 %v574_v44, %v573_v46 }
 0x228   : > { %v576_v48 = vmul.f32 0.35355338, %v575_v47 }
 0x22a   : > { %v578_v42 = vpop.permute.xlu1 %577 }
 0x22b   : > { %v580_v43 = vsel %vm571_vm5, %v578_v42, %v566_v38 }
 0x22c   : > { %v586_v45 = vmul.f32 %v580_v43, %v563_v40 }
 0x22e   : > { %588 = vrot.lane.b32.xlu0 %v586_v45, %s1316_s26  ;;  %s1325_s26 = smov 72  }
 0x236   : > { %809 = vrot.lane.b32.xlu0 %v576_v48, %s1320_s24  ;;  %s1329_s24 = smov 8  }
 0x23e   : > { %637 = vrot.lane.b32.xlu0 %v1499_v36, %s1321_s27  ;;  %s1330_s27 = smov 24  }
 0x2a0   : > { %v589_v50 = vpop.permute.xlu0 %588 }
 0x2a1   : > { %v591_v51 = vadd.f32 %v589_v50, %v585_v49 }
 0x2a3   : > { %667 = vrot.lane.b32.xlu2 %v591_v51, %s1322_s30  ;;  %598 = vrot.lane.b32.xlu1 %v591_v51, %s1323_s16 }
 0x2a8   : > { %v810_v52 = vpop.permute.xlu0 %809 }
 0x2ab   : > { %739 = vrot.lane.b32.xlu2 %v591_v51, %s1319_s25  ;;  %665 = vrot.lane.b32.xlu1 %v576_v48, %s1324_s0  ;;  %s1327_s25 = smov 40  }
 0x2b0   : > { %v638_v53 = vpop.permute.xlu0 %637 }
 0x2b1   : > { %658 = vmatpush.msrb.mxu2 %v638_v53  ;;  %v885_v53 = vld [vmem:[%s1675_s5 + $0x18] sm:$0xff] }
 0x2b3   : > { %811 = vrot.lane.b32.xlu2 %v591_v51, %s1325_s26  ;;  %737 = vrot.lane.b32.xlu1 %v576_v48, %s1318_s23  ;;  %s1326_s23 = smov 56  }
 0x2fd   : > { %v668_v54 = vpop.permute.xlu2 %667 }
 0x2fe   : > { %1148 = vmatpush.xpose.msk.msra.mxu3 %vm600_vm6, %v668_v54  ;;  %v884_v54 = vld [vmem:[%s1675_s5 + $0x10] sm:$0xff] }
 0x305   : > { %v740_v55 = vpop.permute.xlu2 %739 }
 0x30d   : > { %v812_v57 = vpop.permute.xlu2 %811 }
 0x315   : > { %v599_v56 = vpop.permute.xlu1 %598 }
 0x316   : > { %1145 = vmatpush.xpose.msk.msra.mxu1 %vm600_vm6, %v599_v56  ;;  %v882_v56 = vld [vmem:[%s1675_s5] sm:$0xff] }
 0x319   : > { %1146 = vmatmul.msk.f32.vlgmr.msra.gmra.mxu1 %vm600_vm6, %v576_v48 }
 0x31a   : > { %1151 = vmatpush.xpose.msk.msrb.mxu1 %vm600_vm6, %v740_v55  ;;  %v883_v55 = vld [vmem:[%s1675_s5 + $0x8] sm:$0xff] }
 0x31d   : > { %v666_v58 = vpop.permute.xlu1 %665 }
 0x31e   : > { %1154 = vmatpush.xpose.msk.msra.mxu1 %vm600_vm6, %v812_v57  ;;  %1149 = vmatmul.msk.f32.vlgmr.msra.gmra.mxu3 %vm600_vm6, %v666_v58 }
 0x325   : > { %v738_v59 = vpop.permute.xlu1 %737 }
 0x326   : > { %1152 = vmatmul.msk.f32.vlgmr.msrb.gmra.mxu1 %vm600_vm6, %v738_v59 }
 0x327   : > { %905 = vmatpush.msrb.mxu1 %v885_v53  ;;  %v1022_v53 = vld [vmem:[%s1683_s13 + $0x8] sm:$0xff] }
 0x329   : > { %906 = vmatpush.msrb.mxu1 %v884_v54 }
 0x32b   : > { %907 = vmatpush.msrb.mxu1 %v883_v55  ;;  %v1021_v55 = vld [vmem:[%s1683_s13] sm:$0xff] }
 0x32d   : > { %908 = vmatpush.msrb.mxu1 %v882_v56 }
 0x32e   : > { %1155 = vmatmul.msk.f32.vlgmr.msra.gmra.mxu1 %vm600_vm6, %v810_v52 }
 0x396   : > { %v623_v63 = vpop.f32.mrf.mxu1 }
 0x397   : > { %v626_v0 = vsel %vm596_vm7, %v623_v63, -1e+30 }
 0x398   : > { %v627_v1 = vsel %vm600_vm6, %v626_v0, -inf }
 0x399   : > { %628 = vmax.xlane.f32.xlu1 %v627_v1 }
 0x3a1   : > { %v690_v2 = vpop.f32.mrf.mxu3 }
 0x3a2   : > { %v693_v3 = vsel %vm596_vm7, %v690_v2, -1e+30 }
 0x3a3   : > { %v762_v4 = vpop.f32.mrf.mxu1  ;;  %v694_v5 = vsel %vm600_vm6, %v693_v3, -inf }
 0x3a4   : > { %v765_v6 = vsel %vm596_vm7, %v762_v4, -1e+30  ;;  %695 = vmax.xlane.f32.xlu2 %v694_v5 }
 0x3a5   : > { %v766_v7 = vsel %vm600_vm6, %v765_v6, -inf }
 0x3a6   : > { %767 = vmax.xlane.f32.xlu0 %v766_v7  ;;  %v947_v7 = vld [vmem:[%s1681_s11 + $0x8] sm:$0xff] }
 0x3ab   : > { %v834_v9 = vpop.f32.mrf.mxu1 }
 0x3ac   : > { %v837_v10 = vsel %vm596_vm7, %v834_v9, -1e+30  ;;  %v946_v9 = vld [vmem:[%s1681_s11] sm:$0xff] }
 0x3ad   : > { %v838_v11 = vsel %vm600_vm6, %v837_v10, -inf }
 0x3ae   : > { %839 = vmax.xlane.f32.xlu2 %v838_v11 }
 0x3b2   : > { %704 = vrot.lane.b32.xlu1 %v1499_v36, %s1326_s23 }
 0x3ba   : > { %848 = vrot.lane.b32.xlu0 %v1499_v36, %s1327_s25 }
 0x3c6   : > { %776 = vrot.lane.b32.xlu2 %v1499_v36, %s1328_s20 }
 0x40c   : > { %v629_v12 = vpop.xlane.xlu1 %628 }
 0x40d   : > { %v630_v13 = vsub.f32 %v626_v0, %v629_v12 }
 0x40f   : > { %v631_v14 = vmul.f32 1.442695, %v630_v13 }
 0x411   : > { %1231 = vpow2.f32 %v631_v14 }
 0x417   : > { %v1232_v15 = vpop.eup %1231  ;;  %v696_v16 = vpop.xlane.xlu2 %695 }
 0x418   : > { %v697_v17 = vsub.f32 %v693_v3, %v696_v16  ;;  %1147 = vmatmul.msk.f32.vlgmr.msrb.gmra.mxu2 %vm600_vm6, %v1232_v15  ;;  %v633_v31 = vsel %vm600_vm6, %v1232_v15, 0.0 }
 0x419   : > { %v768_v18 = vpop.xlane.xlu0 %767 }
 0x41a   : > { %v698_v19 = vmul.f32 1.442695, %v697_v17  ;;  %v769_v20 = vsub.f32 %v765_v6, %v768_v18  ;;  %v949_v6 = vld [vmem:[%s1681_s11 + $0x18] sm:$0xff] }
 0x41c   : > { %1233 = vpow2.f32 %v698_v19  ;;  %v770_v21 = vmul.f32 1.442695, %v769_v20  ;;  %v1223_v19 = vld [vmem:[%s1679_s9] ss:$0 sm:$0xff] }
 0x41e   : > { %1235 = vpow2.f32 %v770_v21 }
 0x421   : > { %v840_v22 = vpop.xlane.xlu2 %839 }
 0x422   : > { %v1234_v23 = vpop.eup %1233  ;;  %v841_v24 = vsub.f32 %v837_v10, %v840_v22 }
 0x423   : > { %v700_v25 = vsel %vm600_vm6, %v1234_v23, 0.0 }
 0x424   : > { %v1236_v26 = vpop.eup %1235  ;;  %v842_v27 = vmul.f32 1.442695, %v841_v24  ;;  %701 = vadd.xlane.f32.xlu1 %v700_v25  ;;  %v705_v28 = vpop.permute.xlu1 %704  ;;  %v1036_v24 = vld [vmem:[%s1683_s13 + $0x78] sm:$0xff]  ;;  %v1035_v25 = vld [vmem:[%s1683_s13 + $0x70] sm:$0xff] }
 0x425   : > { %725 = vmatpush.msra.mxu2 %v705_v28  ;;  %v772_v29 = vsel %vm600_vm6, %v1236_v26, 0.0  ;;  %1041 = vmatpush.msra.mxu0 %v1036_v24  ;;  %v1225_v28 = vld [vmem:[%s1682_s12] ss:$0 sm:$0xff] }
 0x426   : > { %1237 = vpow2.f32 %v842_v27  ;;  %773 = vadd.xlane.f32.xlu2 %v772_v29  ;;  %1150 = vmatmul.msk.f32.vlgmr.msra.gmra.mxu2 %vm600_vm6, %v1234_v23  ;;  %v1033_v27 = vld [vmem:[%s1683_s13 + $0x60] sm:$0xff]  ;;  %v1032_v29 = vld [vmem:[%s1683_s13 + $0x58] sm:$0xff] }
 0x427   : > { %1042 = vmatpush.msra.mxu0 %v1035_v25 }
 0x429   : > { %v777_v30 = vpop.permute.xlu2 %776 }
 0x42a   : > { %797 = vmatpush.msrb.mxu3 %v777_v30  ;;  %v1031_v30 = vld [vmem:[%s1683_s13 + $0x50] sm:$0xff] }
 0x42b   : > { %1153 = vmatmul.msk.f32.vlgmr.msrb.gmra.mxu3 %vm600_vm6, %v1236_v26  ;;  %v1034_v26 = vld [vmem:[%s1683_s13 + $0x68] sm:$0xff] }
 0x42c   : > { %v1238_v32 = vpop.eup %1237  ;;  %v849_v34 = vpop.permute.xlu0 %848  ;;  %634 = vadd.xlane.f32.xlu1 %v633_v31  ;;  %969 = vmatpush.msra.mxu3 %v949_v6 }
 0x42d   : > { %869 = vmatpush.msrb.mxu2 %v849_v34  ;;  %v844_v35 = vsel %vm600_vm6, %v1238_v32, 0.0  ;;  %1043 = vmatpush.msra.mxu0 %v1034_v26 }
 0x42e   : > { %845 = vadd.xlane.f32.xlu0 %v844_v35  ;;  %1156 = vmatmul.msk.f32.vlgmr.msrb.gmra.mxu2 %vm600_vm6, %v1238_v32  ;;  %v1030_v32 = vld [vmem:[%s1683_s13 + $0x48] sm:$0xff]  ;;  %v1029_v35 = vld [vmem:[%s1683_s13 + $0x40] sm:$0xff] }
 0x42f   : > { %1044 = vmatpush.msra.mxu0 %v1033_v27 }
 0x431   : > { %1045 = vmatpush.msra.mxu0 %v1032_v29 }
 0x433   : > { %1046 = vmatpush.msra.mxu0 %v1031_v30 }
 0x435   : > { %1047 = vmatpush.msra.mxu0 %v1030_v32 }
 0x437   : > { %1048 = vmatpush.msra.mxu0 %v1029_v35 }
 0x497   : > { %v702_v36 = vpop.xlane.xlu1 %701 }
 0x499   : > { %v774_v39 = vpop.xlane.xlu2 %773 }
 0x49b   : > { %v660_v38 = vpop.f32.mrf.mxu2 }
 0x49f   : > { %v635_v37 = vpop.xlane.xlu1 %634 }
 0x4a0   : > { %1239 = vrcp.f32 %v635_v37  ;;  %v1028_v37 = vld [vmem:[%s1683_s13 + $0x38] sm:$0xff] }
 0x4a1   : > { %1241 = vrcp.f32 %v702_v36  ;;  %v846_v42 = vpop.xlane.xlu0 %845  ;;  %1049 = vmatpush.msra.mxu0 %v1028_v37 }
 0x4a2   : > { %1243 = vrcp.f32 %v774_v39  ;;  %v1027_v39 = vld [vmem:[%s1683_s13 + $0x30] sm:$0xff] }
 0x4a3   : > { %1245 = vrcp.f32 %v846_v42  ;;  %1050 = vmatpush.msra.mxu0 %v1027_v39 }
 0x4a6   : > { %v1240_v40 = vpop.eup %1239 }
 0x4a7   : > { %v663_v41 = vmul.f32 %v1240_v40, %v660_v38  ;;  %v1242_v43 = vpop.eup %1241 }
 0x4a8   : > { %v1244_v46 = vpop.eup %1243 }
 0x4a9   : > { %v727_v44 = vpop.f32.mrf.mxu2  ;;  %664 = vst.msk [vmem:[#allocation2] sm:$0xff] %vm600_vm6, %v663_v41  ;;  %v1246_v49 = vpop.eup %1245  ;;  %v1026_v41 = vld [vmem:[%s1683_s13 + $0x28] sm:$0xff] }
 0x4aa   : > { %v730_v45 = vmul.f32 %v1242_v43, %v727_v44  ;;  %v1025_v44 = vld [vmem:[%s1683_s13 + $0x20] sm:$0xff]  ;;  %1051 = vmatpush.msra.mxu0 %v1026_v41 }
 0x4ac   : > { %732 = vrot.lane.b32.xlu2 %v730_v45, %s1329_s24  ;;  %1052 = vmatpush.msra.mxu0 %v1025_v44  ;;  %s1161_s24 = sshll.u32 %s1432_s22, 3 }
 0x4ad   : > { %s1074_s26 = scalar_lea.hbm %s1685_s15, %s1161_s24 }
 0x4ae   : > { %v799_v47 = vpop.f32.mrf.mxu3  ;;  %s1078_s1 = sshll.u32 %s1074_s26, 4  ;;  %s1079_s1 = int_to_ptr.hbm [resolvable:$true] %s1078_s1 }
 0x4af   : > { %v802_v48 = vmul.f32 %v1244_v46, %v799_v47  ;;  %v1024_v47 = vld [vmem:[%s1683_s13 + $0x18] sm:$0xff]  ;;  %s1265_s2 = sshra.s32 %s1079_s1, 4  ;;  %s1266_s2 = int_to_ptr.hbm [resolvable:$true] %s1265_s2 }
 0x4b0   : > { %1053 = vmatpush.msra.mxu0 %v1024_v47  ;;  %p1272_p0 = scmp.lt.s32.totalorder %s1266_s2, %s1685_s15 }
 0x4b1   : > { %804 = vrot.lane.b32.xlu0 %v802_v48, %s1317_s17  ;;  %v871_v50 = vpop.f32.mrf.mxu2  ;;  %s483_s17 = sand.u32 1, %s1305_s19  }
 0x4b2   : > { %v874_v51 = vmul.f32 %v1246_v49, %v871_v50  ;;  %v1023_v50 = vld [vmem:[%s1683_s13 + $0x10] sm:$0xff]  ;;  %s1142_s20 = sshll.u32 %s483_s17, 3  ;;  %s1064_s22 = scalar_lea.sflag [#allocation4], %s483_s17 }
 0x4b3   : > { %1054 = vmatpush.msra.mxu0 %v1023_v50  ;;  %s485_s23 = scalar_lea.vmem [#allocation3], %s1142_s20  ;;  %s1271_s20 = scalar_lea.hbm %s1685_s15, 16 }
 0x4b4   : > { %876 = vrot.lane.b32.xlu1 %v874_v51, %s1330_s27  ;;  %s1076_s25 = sshll.u32 %s485_s23, 4  ;;  %s1267_s27 = scalar_lea.hbm %s1266_s2, 8  ;;  %s1077_s25 = int_to_ptr.vmem [resolvable:$true] %s1076_s25 }
 0x4b5   : > { %1055 = vmatpush.msra.mxu0 %v1022_v53  ;;  %p1268_p11 = scmp.ne.s32.totalorder %s1266_s2, %s1267_s27  ;;  %p1273_p1 = scmp.lt.s32.totalorder %s1271_s20, %s1267_s27 }
 0x4b7   : > { %1056 = vmatpush.msra.mxu0 %v1021_v55  ;;  %p1269_p12 = pnand %p1268_p11, %p1449_p5  ;;  %p1274_p2 = por %p1273_p1, %p1272_p0 }
 0x4b9   : > { %p1270_p13 = pneg %p1269_p12 }
 0x4bb   : > { %p1275_p3 = pnand %p1274_p2, %p1270_p13 }
 0x506   : > { %v733_v52 = vpop.permute.xlu2 %732 }
 0x507   : > { %736 = vst.msk [vmem:[#allocation2] sm:$0xff] %vm735_vm8, %v733_v52 }
 0x523   : > { %v805_v57 = vpop.permute.xlu0 %804 }
 0x524   : > { %808 = vst.msk [vmem:[#allocation2] sm:$0xff] %vm807_vm9, %v805_v57 }
 0x526   : > { %v877_v58 = vpop.permute.xlu1 %876 }
 0x527   : > { %880 = vst.msk [vmem:[#allocation2] sm:$0xff] %vm879_vm10, %v877_v58 }
 0x52e   : > { %v881_v59 = vld [vmem:[#allocation2] sm:$0xff] }
 0x52f   : > { %1157 = vmatmul.msk.f32.vlgmr.msrb.gmra.mxu1 %vm491_vm0, %v881_v59 }
 0x5ac   : > { %v910_v61 = vpop.f32.mrf.mxu1 }
 0x5ad   : > { %v911_v62 = vadd.f32 %v1222_v60, %v910_v61 }
 0x5af   : > { %v913_v63 = vadd.f32 %v911_v62, %v1492_v33  ;;  %v948_v33 = vld [vmem:[%s1681_s11 + $0x10] sm:$0xff] }
 0x5b0   : > { %970 = vmatpush.msra.mxu3 %v948_v33 }
 0x5b1   : > { %v914_v0 = vsel %vm491_vm0, %v913_v63, 0.0 }
 0x5b2   : > { %915 = vadd.xlane.f32.xlu0 %v914_v0  ;;  %971 = vmatpush.msra.mxu3 %v947_v7 }
 0x5b4   : > { %972 = vmatpush.msra.mxu3 %v946_v9 }
 0x625   : > { %v916_v1 = vpop.xlane.xlu0 %915 }
 0x626   : > { %v917_v2 = vmul.f32 %v916_v1, %v1465_v8 }
 0x628   : > { %v918_v3 = vsub.f32 %v913_v63, %v917_v2 }
 0x62a   : > { %v919_v4 = vmul.f32 %v918_v3, %v918_v3 }
 0x62c   : > { %v920_v5 = vsel %vm491_vm0, %v919_v4, 0.0 }
 0x62d   : > { %921 = vadd.xlane.f32.xlu2 %v920_v5 }
 0x6a0   : > { %v922_v10 = vpop.xlane.xlu2 %921 }
 0x6a1   : > { %v923_v11 = vmul.f32 %v922_v10, %v1465_v8  ;;  %v1224_v8 = vld [vmem:[%s1680_s10] ss:$0 sm:$0xff] }
 0x6a3   : > { %v924_v12 = vadd.f32 1e-05, %v923_v11 }
 0x6a5   : > { %1247 = vrsqrt.f32 %v924_v12  ;;  %vm931_vm12 = vweird.f32 %v924_v12 }
 0x6ab   : > { %v1248_v13 = vpop.eup %1247 }
 0x6ac   : > { %v926_v14 = vmul.f32 %v1248_v13, %v924_v12  ;;  %vm932_vm11 = vweird.f32 %v1248_v13 }
 0x6ad   : > { %vm933_vm13 = vmor %vm931_vm12, %vm932_vm11 }
 0x6ae   : > { %v927_v15 = vmul.f32 %v1248_v13, %v926_v14 }
 0x6b0   : > { %v928_v16 = vmul.f32 0.5, %v927_v15 }
 0x6b2   : > { %v929_v17 = vsub.f32 1.5, %v928_v16 }
 0x6b4   : > { %v930_v18 = vmul.f32 %v1248_v13, %v929_v17 }
 0x6b6   : > { %v934_v20 = vsel %vm933_vm13, %v1248_v13, %v930_v18 }
 0x6b7   : > { %v935_v21 = vmul.f32 %v934_v20, %v918_v3 }
 0x6b9   : > { %v940_v22 = vmul.f32 %v1223_v19, %v935_v21  ;;  %v1226_v19 = vld [vmem:[%s1684_s14] ss:$0 sm:$0xff] }
 0x6bb   : > { %v1578_v23 = vadd.f32 %v1224_v8, %v940_v22 }
 0x6bd   : > { %1158 = vmatmul.msk.f32.vlgmr.msra.gmra.mxu3 %vm491_vm0, %v1578_v23 }
 0x740   : > { %v974_v31 = vpop.f32.mrf.mxu3 }
 0x741   : > { %v975_v34 = vadd.f32 %v1225_v28, %v974_v31 }
 0x743   : > { %v978_v36 = vmul.f32 0.70710677, %v975_v34  ;;  %v977_v16 = vmul.f32 0.5, %v975_v34 }
 0x745   : > { %v979_v38 = vmul.f32 %v978_v36, %v978_v36 }
 0x747   : > { %v980_v40 = vmin.f32 %v979_v38, 16.0 }
 0x749   : > { %v981_v42 = vmul.f32 2.1237322e-06, %v980_v40  ;;  %v992_v43 = vmul.f32 3.8918573e-05, %v980_v40 }
 0x74b   : > { %v982_v45 = vadd.f32 0.00028619796, %v981_v42  ;;  %v993_v46 = vadd.f32 0.001143296, %v992_v43 }
 0x74d   : > { %v983_v48 = vmul.f32 %v982_v45, %v980_v40  ;;  %v994_v49 = vmul.f32 %v993_v46, %v980_v40 }
 0x74f   : > { %v995_v51 = vadd.f32 0.014752088, %v994_v49  ;;  %v984_v52 = vadd.f32 0.0036580483, %v983_v48 }
 0x751   : > { %v996_v54 = vmul.f32 %v995_v51, %v980_v40  ;;  %v985_v57 = vmul.f32 %v984_v52, %v980_v40 }
 0x753   : > { %v997_v56 = vadd.f32 0.112945676, %v996_v54  ;;  %v986_v60 = vadd.f32 0.05243302, %v985_v57 }
 0x755   : > { %v998_v58 = vmul.f32 %v997_v56, %v980_v40  ;;  %v987_v63 = vmul.f32 %v986_v60, %v980_v40 }
 0x757   : > { %v999_v59 = vadd.f32 0.4994258, %v998_v58  ;;  %v988_v0 = vadd.f32 0.18741608, %v987_v63 }
 0x759   : > { %v1000_v61 = vmul.f32 %v999_v59, %v980_v40  ;;  %v989_v2 = vmul.f32 %v988_v0, %v980_v40 }
 0x75b   : > { %v1001_v62 = vadd.f32 1.0, %v1000_v61  ;;  %v990_v6 = vadd.f32 1.1283791, %v989_v2 }
 0x75d   : > { %1249 = vrcp.f32 %v1001_v62  ;;  %v1013_v5 = vand.u32 2147483648, %v1001_v62  ;;  %v1011_v7 = vand.u32 2147483647, %v1001_v62  ;;  %vm1007_vm15 = vweird.f32 %v1001_v62 }
 0x75e   : > { %v991_v11 = vmul.f32 %v990_v6, %v978_v36 }
 0x75f   : > { %v1014_v10 = vor.u32 1.1754944e-38, %v1013_v5  ;;  %vm1012_vm2 = vcmp.eq.f32.partialorder %v1011_v7, 8.507059e+37 }
 0x763   : > { %v1250_v1 = vpop.eup %1249 }
 0x764   : > { %v1003_v3 = vmul.f32 %v1250_v1, %v1001_v62  ;;  %vm1008_vm14 = vweird.f32 %v1250_v1 }
 0x765   : > { %vm1009_vm1 = vmor %vm1007_vm15, %vm1008_vm14 }
 0x766   : > { %v1004_v4 = vsub.f32 1.0, %v1003_v3 }
 0x768   : > { %v1005_v33 = vmul.f32 %v1250_v1, %v1004_v4 }
 0x76a   : > { %v1006_v9 = vadd.f32 %v1250_v1, %v1005_v33 }
 0x76c   : > { %v1010_v12 = vsel %vm1009_vm1, %v1250_v1, %v1006_v9 }
 0x76d   : > { %v1015_v13 = vsel %vm1012_vm2, %v1014_v10, %v1010_v12 }
 0x76e   : > { %v1016_v14 = vmul.f32 %v1015_v13, %v991_v11 }
 0x770   : > { %v1159_v15 = vclamps-f32 %v1016_v14, 1.0 }
 0x772   : > { %v1019_v17 = vadd.f32 1.0, %v1159_v15 }
 0x774   : > { %v1020_v18 = vmul.f32 %v1019_v17, %v977_v16 }
 0x776   : > { %1057 = vmatmul.f32.vlgmr.msra.gmra.mxu0 %v1020_v18 }
 0x7f3   : > { %v1058_v20 = vpop.f32.mrf.mxu0 }
 0x7f4   : > { %v1059_v21 = vadd.f32 %v1226_v19, %v1058_v20 }
 0x7f6   : > { %v1061_v8 = vadd.f32 %v1059_v21, %v1578_v23 }
 0x7f8   : > { %1062 = vst.msk [vmem:[%s485_s23] sm:$0xff] %vm491_vm0, %v1061_v8 }
 0x7f9   : > { %1278 = shalt.err (!%p1275_p3)
}
 0x7fa   : > { %1164 = dma.vmem_to_hbm [thread:$0]  (%p1449_p5), %s1077_s25, 128, %s1079_s1, %s1064_s22  }
 0x7fb PF: > { %p1170_p4 = scmp.ge.s32.totalorder %s1313_s21, 2  ;;  %s1090_s17 = sand.u32 1, %s1301_s18  }
 0x7fc   : > { %s1091_s26 = scalar_lea.sflag [#allocation4], %s1090_s17 }
 0x7fd   : > { %p1167_p7 = pnand %p1170_p4, %p1453_p6 }
 0x7ff   : > { %p1168_p8 = pneg %p1167_p7 }
 0x801   : > { %1296 = dma.done.wait (%p1168_p8), %s1091_s26, 128  }
 0x802   : > { %1298 = vsyncadd (%p1168_p8), %s1091_s26, 4294967168  ;;  %s1700_s21 = sld [smem:[#allocation7_spill]]  ;;  %s1703_s18 = smov %s1305_s19 }
 0x803   : > { %s1701_s2 = sld [smem:[#allocation6_spill]] }
 0x804   : > { %s1702_s20 = sld [smem:[#allocation8_spill]] }
 0x808   : > { %p25_p9 = scmp.ge.s32.totalorder %s1700_s21, 4  }
 0x809   : > { %s1704_s19 = smov %s1701_s2 }
 0x80a   :  { %27 = sbr.rel (!%p25_p9) target bundleno = 7 (0x7), region = 115 }
 0x80f   :  { %1097 = vsyncpa [#allocation4], 1 }
 0x810   :  { %1099 = vsyncpa [#allocation4 + $0x1], 1 }

</bundles_post_ra>
